<compile_context>
chip_gen: v6e
topology: v6e:2x2x1
jax: 0.10.0
libtpu: 0.0.40
codegen_flags: <defaults>
</compile_context>

<pallas_src>
import math
import functools

import jax
import jax.numpy as jnp
from jax.experimental import pallas as pl
from jax.experimental.pallas import tpu as pltpu


def _round_up(x: int, m: int) -> int:
    return (x + m - 1) // m * m


def _fused_linear_bias_gelu_kernel(x_ref, w_ref, b_ref, o_ref, acc_ref, *, approximate):
    """One grid step. Grid = (M_tiles, N_tiles, K_tiles); K is the reduction axis.

    x tile: (tm, tk), w tile: (tk, tn)  -> feeds the MXU directly (no transpose).
    The f32 accumulator lives in VMEM scratch and persists across the K axis.
    Bias + GELU epilogue runs only on the last K step.
    """
    k = pl.program_id(2)

    @pl.when(k == 0)
    def _():
        acc_ref[...] = jnp.zeros_like(acc_ref)

    acc_ref[...] += jnp.dot(
        x_ref[...], w_ref[...], preferred_element_type=jnp.float32
    )

    @pl.when(k == pl.num_programs(2) - 1)
    def _():
        acc = acc_ref[...] + b_ref[0:1, :]  # bias is f32, (1, tn) broadcast
        if approximate:
            # tanh approximation (EUP path); only used if the accuracy contract allows.
            c = math.sqrt(2.0 / math.pi)
            g = 0.5 * acc * (1.0 + jnp.tanh(c * (acc + 0.044715 * acc * acc * acc)))
        else:
            # Exact erf GELU, matching torch.nn.functional.gelu default.
            g = 0.5 * acc * (1.0 + jax.lax.erf(acc * (1.0 / math.sqrt(2.0))))
        o_ref[...] = g.astype(o_ref.dtype)


@functools.partial(
    jax.jit, static_argnames=("tm", "tn", "tk", "operand_dtype", "approximate")
)
def fused_linear_bias_gelu(
    x2d, weight_t, bias, *, tm=512, tn=512, tk=512, operand_dtype=None, approximate=False
):
    """y = gelu(x2d @ weight_t + bias), fused in one Pallas TPU kernel.

    x2d:      (M, K)
    weight_t: (K, N)   -- weight pre-transposed once (torch layout is (N, K))
    bias:     (N,)
    returns   (M, N) in x2d's dtype (accumulation is always f32).
    """
    M, K = x2d.shape
    K2, N = weight_t.shape
    assert K == K2 and bias.shape == (N,)

    out_dtype = x2d.dtype
    if operand_dtype is not None:
        x2d = x2d.astype(operand_dtype)
        weight_t = weight_t.astype(operand_dtype)
    op_dtype = x2d.dtype

    # Tiling: MXU/lane aligned, clipped to the (padded) problem size.
    lane = 128
    sub = 16 if op_dtype == jnp.bfloat16 else 8
    tm = _round_up(min(tm, _round_up(M, sub)), sub)
    tn = _round_up(min(tn, _round_up(N, lane)), lane)
    tk = _round_up(min(tk, _round_up(K, lane)), lane)

    # Pad up to tile multiples (zero padding is exact: padded K contributes 0,
    # padded M/N rows/cols are sliced off afterwards).
    M_pad, N_pad, K_pad = _round_up(M, tm), _round_up(N, tn), _round_up(K, tk)
    if (M_pad, K_pad) != (M, K):
        x2d = jnp.pad(x2d, ((0, M_pad - M), (0, K_pad - K)))
    if (K_pad, N_pad) != (K, N):
        weight_t = jnp.pad(weight_t, ((0, K_pad - K), (0, N_pad - N)))

    bias_f32 = bias.astype(jnp.float32)
    if N_pad != N:
        bias_f32 = jnp.pad(bias_f32, (0, N_pad - N))
    # Replicate bias to 8 sublanes so its tile fills whole vregs.
    bias2d = jnp.tile(bias_f32.reshape(1, N_pad), (8, 1))

    grid = (M_pad // tm, N_pad // tn, K_pad // tk)
    k_tiles = grid[2]

    # Deeper input buffering only pays off when the K loop is long enough.
    if k_tiles >= 3:
        n_buf = 3
        x_spec = pl.BlockSpec((tm, tk), lambda i, j, k: (i, k),
                              pipeline_mode=pl.Buffered(3))
        w_spec = pl.BlockSpec((tk, tn), lambda i, j, k: (k, j),
                              pipeline_mode=pl.Buffered(3))
    else:
        n_buf = 2
        x_spec = pl.BlockSpec((tm, tk), lambda i, j, k: (i, k))
        w_spec = pl.BlockSpec((tk, tn), lambda i, j, k: (k, j))

    # Explicit VMEM budget derived from the tile footprint; capped well under the
    # v7x 64 MiB physical ceiling so the same config is safe on v5e/v6e/v7x.
    op_bytes = op_dtype.itemsize
    out_bytes = out_dtype.itemsize
    vmem_need = (
        n_buf * tm * tk * op_bytes          # x buffers
        + n_buf * tk * tn * op_bytes        # w buffers
        + 2 * 8 * tn * 4                    # bias buffers
        + 2 * tm * tn * out_bytes           # output buffers
        + tm * tn * 4                       # f32 accumulator scratch
    )
    vmem_limit = min(max(int(vmem_need * 1.5), 16 * 1024 * 1024), 56 * 1024 * 1024)

    cost = pl.CostEstimate(
        flops=2 * M_pad * N_pad * K_pad,
        transcendentals=M_pad * N_pad,
        bytes_accessed=int(
            grid[1] * M_pad * K_pad * op_bytes     # x re-read per N tile
            + grid[0] * K_pad * N_pad * op_bytes   # w re-read per M tile
            + M_pad * N_pad * out_bytes            # output write
        ),
    )

    kernel = functools.partial(_fused_linear_bias_gelu_kernel, approximate=approximate)

    out = pl.pallas_call(
        kernel,
        out_shape=jax.ShapeDtypeStruct((M_pad, N_pad), out_dtype),
        grid_spec=pltpu.PrefetchScalarGridSpec(
            num_scalar_prefetch=0,
            grid=grid,
            in_specs=[
                x_spec,                                        # x      (tm, tk)
                w_spec,                                        # weight (tk, tn)
                pl.BlockSpec((8, tn), lambda i, j, k: (0, j)),  # bias   (8, tn)
            ],
            out_specs=pl.BlockSpec((tm, tn), lambda i, j, k: (i, j)),
            scratch_shapes=[pltpu.VMEM((tm, tn), jnp.float32)],
        ),
        compiler_params=pltpu.CompilerParams(
            dimension_semantics=("parallel", "parallel", "arbitrary"),
            vmem_limit_bytes=vmem_limit,
        ),
        cost_estimate=cost,
    )(x2d, weight_t, bias2d)

    if (M_pad, N_pad) != (M, N):
        out = out[:M, :N]
    return out


# --------------------------------------------------------------------------------------
# Minimal JAX analogue of transformer_engine FusedOperation: holds no parameters itself,
# reads them from its basic ops, and dispatches the chained forward to one fused kernel.
# --------------------------------------------------------------------------------------

class _BasicLinear:
    """BasicLinear basic op: holds the weight, stored pre-transposed as (K, N)."""

    def __init__(self, in_features, out_features, key, dtype=jnp.float32):
        bound = 1.0 / math.sqrt(in_features)
        w = jax.random.uniform(
            key, (out_features, in_features), dtype=dtype, minval=-bound, maxval=bound
        )
        # (K, N) layout feeds the MXU directly (no per-tile transpose in the kernel).
        self.weight_t = jnp.asarray(w.T)


class _Bias:
    """Bias basic op: holds the bias vector."""

    def __init__(self, features, key, dtype=jnp.float32, in_features=None):
        bound = 1.0 / math.sqrt(in_features if in_features is not None else features)
        self.bias = jax.random.uniform(
            key, (features,), dtype=dtype, minval=-bound, maxval=bound
        )


class _GELU:
    """GELU basic op (exact erf GELU by default, matching torch)."""

    approximate = False


class FusedOperationJAX:
    """JAX analogue of transformer_engine FusedOperation([BasicLinear, Bias, GELU])."""

    def __init__(self, basic_ops):
        basic_ops = list(basic_ops)
        if len(basic_ops) == 0:
            raise ValueError(
                "Attempted to construct a fused operation without specifying its "
                "corresponding basic operations"
            )
        self.basic_ops = basic_ops

    @property
    def is_fused_op(self) -> bool:
        return True

    def __call__(self, x, *, operand_dtype=None):
        linear, bias_op, gelu = self.basic_ops
        *lead, hidden = x.shape
        x2d = x.reshape(-1, hidden)
        y2d = fused_linear_bias_gelu(
            x2d,
            linear.weight_t,
            bias_op.bias,
            operand_dtype=operand_dtype,
            approximate=gelu.approximate,
        )
        return y2d.reshape(*lead, linear.weight_t.shape[1])


if __name__ == "__main__":
    # ---- Test 1: small f32 problem, exact erf-GELU (matches torch semantics) ----
    batch, seq, hidden, out_features = 2, 8, 32, 32
    kx, kw, kb = jax.random.split(jax.random.PRNGKey(0), 3)
    x = jax.random.normal(kx, (batch, seq, hidden), dtype=jnp.float32)

    fused_op = FusedOperationJAX(
        [
            _BasicLinear(hidden, out_features, kw),
            _Bias(out_features, kb, in_features=hidden),
            _GELU(),
        ]
    )
    y = jax.block_until_ready(fused_op(x))

    ref = x.reshape(-1, hidden) @ fused_op.basic_ops[0].weight_t + fused_op.basic_ops[1].bias
    ref = 0.5 * ref * (1.0 + jax.lax.erf(ref / math.sqrt(2.0)))
    ref = ref.reshape(batch, seq, out_features)
    assert y.shape == ref.shape
    assert jnp.allclose(y, ref, atol=1e-5, rtol=1e-5), "f32 mismatch vs reference"

    # ---- Test 2: bf16-operand fast path, non-divisible shapes (pad + slice),
    #              multi-step K reduction with 3-deep input buffering ----
    M2, K2, N2 = 200, 1300, 600
    kx2, kw2, kb2 = jax.random.split(jax.random.PRNGKey(1), 3)
    x2 = jax.random.normal(kx2, (M2, K2), dtype=jnp.float32)
    w2t = jax.random.normal(kw2, (K2, N2), dtype=jnp.float32) * (1.0 / math.sqrt(K2))
    b2 = jax.random.normal(kb2, (N2,), dtype=jnp.float32) * 0.1

    y2 = jax.block_until_ready(
        fused_linear_bias_gelu(x2, w2t, b2, operand_dtype=jnp.bfloat16)
    )

    xr = x2.astype(jnp.bfloat16).astype(jnp.float32)
    wr = w2t.astype(jnp.bfloat16).astype(jnp.float32)
    ref2 = xr @ wr + b2
    ref2 = 0.5 * ref2 * (1.0 + jax.lax.erf(ref2 / math.sqrt(2.0)))
    assert y2.shape == (M2, N2)
    assert jnp.allclose(y2, ref2, atol=2e-2, rtol=2e-2), "bf16 mismatch vs reference"

    print("KERNEL_OK")
</pallas_src>

<mosaic_0001>
module attributes {stable_mosaic.version = 11 : i64} {
  func.func @_fused_linear_bias_gelu_kernel(%arg0: i32, %arg1: i32, %arg2: i32, %arg3: memref<16x128xf32, #tpu.memory_space<vmem>>, %arg4: memref<128x128xf32, #tpu.memory_space<vmem>>, %arg5: memref<8x128xf32, #tpu.memory_space<vmem>>, %arg6: memref<16x128xf32, #tpu.memory_space<vmem>>, %arg7: memref<16x128xf32, #tpu.memory_space<vmem>>) attributes {dimension_semantics = [#tpu.dimension_semantics<parallel>, #tpu.dimension_semantics<parallel>, #tpu.dimension_semantics<arbitrary>], iteration_bounds = array<i64: 1, 1, 1>, scalar_prefetch = 0 : i64, scratch_operands = 1 : i64, tpu.core_type = #tpu.core_type<tc>, window_params = [{transform_indices = @transform_0, window_bounds = array<i64: 16, 128>}, {transform_indices = @transform_1, window_bounds = array<i64: 128, 128>}, {transform_indices = @transform_2, window_bounds = array<i64: 8, 128>}, {transform_indices = @transform_3, window_bounds = array<i64: 16, 128>}]} {
    %c0_i32 = arith.constant 0 : i32
    %0 = arith.cmpi eq, %arg2, %c0_i32 : i32
    %1 = arith.extui %0 : i1 to i32
    %c0_i32_0 = arith.constant 0 : i32
    %2 = arith.cmpi ne, %1, %c0_i32_0 : i32
    scf.if %2 {
      %cst_10 = arith.constant 0.000000e+00 : f32
      %12 = vector.broadcast %cst_10 : f32 to vector<16x128xf32>
      %c0_11 = arith.constant 0 : index
      %c0_12 = arith.constant 0 : index
      %13 = vector.load %arg7[%c0_11, %c0_12] : memref<16x128xf32, #tpu.memory_space<vmem>>, vector<16x128xf32>
      tpu.vector_store %arg7[%c0_11, %c0_12], %12 {strides = array<i32>} : memref<16x128xf32, #tpu.memory_space<vmem>>, vector<16x128xf32>,
    } else {
    }
    %c0 = arith.constant 0 : index
    %c0_1 = arith.constant 0 : index
    %3 = vector.load %arg7[%c0, %c0_1] : memref<16x128xf32, #tpu.memory_space<vmem>>, vector<16x128xf32>
    %c0_2 = arith.constant 0 : index
    %c0_3 = arith.constant 0 : index
    %4 = vector.load %arg3[%c0_2, %c0_3] : memref<16x128xf32, #tpu.memory_space<vmem>>, vector<16x128xf32>
    %c0_4 = arith.constant 0 : index
    %c0_5 = arith.constant 0 : index
    %5 = vector.load %arg4[%c0_4, %c0_5] : memref<128x128xf32, #tpu.memory_space<vmem>>, vector<128x128xf32>
    %cst = arith.constant dense<0.000000e+00> : vector<16x128xf32>
    %6 = tpu.matmul %4, %5, %cst {dimension_numbers = #tpu.dot_dimension_numbers<[1], [0], [0], [1], [0, 0, 1, 1], [], []>} : vector<16x128xf32>, vector<128x128xf32>, vector<16x128xf32> -> vector<16x128xf32>
    %7 = arith.addf %3, %6 : vector<16x128xf32>
    %c0_6 = arith.constant 0 : index
    %c0_7 = arith.constant 0 : index
    %8 = vector.load %arg7[%c0_6, %c0_7] : memref<16x128xf32, #tpu.memory_space<vmem>>, vector<16x128xf32>
    tpu.vector_store %arg7[%c0_6, %c0_7], %7 {strides = array<i32>} : memref<16x128xf32, #tpu.memory_space<vmem>>, vector<16x128xf32>,
    %c0_i32_8 = arith.constant 0 : i32
    %9 = arith.cmpi eq, %arg2, %c0_i32_8 : i32
    %10 = arith.extui %9 : i1 to i32
    %c0_i32_9 = arith.constant 0 : i32
    %11 = arith.cmpi ne, %10, %c0_i32_9 : i32
    scf.if %11 {
      %c0_10 = arith.constant 0 : index
      %c0_11 = arith.constant 0 : index
      %12 = vector.load %arg7[%c0_10, %c0_11] : memref<16x128xf32, #tpu.memory_space<vmem>>, vector<16x128xf32>
      %c0_12 = arith.constant 0 : index
      %c0_13 = arith.constant 0 : index
      %13 = vector.load %arg5[%c0_12, %c0_13] : memref<8x128xf32, #tpu.memory_space<vmem>>, vector<1x128xf32>
      %14 = vector.broadcast %13 : vector<1x128xf32> to vector<16x128xf32>
      %15 = arith.addf %12, %14 : vector<16x128xf32>
      %cst_14 = arith.constant 5.000000e-01 : f32
      %16 = vector.broadcast %cst_14 : f32 to vector<16x128xf32>
      %17 = arith.mulf %16, %15 : vector<16x128xf32>
      %cst_15 = arith.constant 0.707106769 : f32
      %18 = vector.broadcast %cst_15 : f32 to vector<16x128xf32>
      %19 = arith.mulf %15, %18 : vector<16x128xf32>
      %20 = math.erf %19 : vector<16x128xf32>
      %cst_16 = arith.constant 1.000000e+00 : f32
      %21 = vector.broadcast %cst_16 : f32 to vector<16x128xf32>
      %22 = arith.addf %21, %20 : vector<16x128xf32>
      %23 = arith.mulf %17, %22 : vector<16x128xf32>
      %c0_17 = arith.constant 0 : index
      %c0_18 = arith.constant 0 : index
      %24 = vector.load %arg6[%c0_17, %c0_18] : memref<16x128xf32, #tpu.memory_space<vmem>>, vector<16x128xf32>
      tpu.vector_store %arg6[%c0_17, %c0_18], %23 {strides = array<i32>} : memref<16x128xf32, #tpu.memory_space<vmem>>, vector<16x128xf32>,
    } else {
    }
    return
  }
  func.func @transform_0(%arg0: i32, %arg1: i32, %arg2: i32) -> (i32, i32) {
    %c0_i32 = arith.constant 0 : i32
    return %arg0, %arg2 : i32, i32
  }
  func.func @transform_1(%arg0: i32, %arg1: i32, %arg2: i32) -> (i32, i32) {
    %c0_i32 = arith.constant 0 : i32
    return %arg2, %arg1 : i32, i32
  }
  func.func @transform_2(%arg0: i32, %arg1: i32, %arg2: i32) -> (i32, i32) {
    %c0_i32 = arith.constant 0 : i32
    %c0_i32_0 = arith.constant 0 : i32
    return %c0_i32, %arg1 : i32, i32
  }
  func.func @transform_3(%arg0: i32, %arg1: i32, %arg2: i32) -> (i32, i32) {
    %c0_i32 = arith.constant 0 : i32
    return %arg0, %arg1 : i32, i32
  }
}

</mosaic_0001>

<bundles_post_ra>
// kernel: fused_linear_bias_gelu.1
= control target key start
LH: loop header
LB: loop body
LE: loop exit
PB: predicated region body
PF: predicated region fallthrough
CT: control target
= control target key end

     0   :  { %s326_s0 = inlined_call_operand.vmem [shape: f32[16,128], index: 0, kind: input, shape index: {}]   ;;  %s327_s1 = inlined_call_operand.vmem [shape: f32[128,128], index: 1, kind: input, shape index: {}]   ;;  %s328_s2 = inlined_call_operand.vmem [shape: f32[8,128], index: 2, kind: input, shape index: {}]   ;;  %s329_s3 = inlined_call_operand.hbm [shape: f32[16,128], index: 3, kind: output, shape index: {}]  }
   0x1   :  { %v40_v0 = vld [vmem:[%s327_s1 + $0x78] sm:$0xff]  ;;  %v39_v1 = vld [vmem:[%s327_s1 + $0x70] sm:$0xff]  ;;  %v38_v2 = vld [vmem:[%s327_s1 + $0x68] sm:$0xff] }
   0x2   :  { %179 = vmatprep.subr.mxu0 %v40_v0  ;;  %v37_v3 = vld [vmem:[%s327_s1 + $0x60] sm:$0xff]  ;;  %v36_v5 = vld [vmem:[%s327_s1 + $0x58] sm:$0xff] }
   0x3   :  { %180 = vmatpush3.msra.mxu0 %v40_v0  ;;  %v23_v4 = vld [vmem:[%s326_s0] sm:$0xff] }
   0x4   :  { %181 = vmatprep.subr.mxu0 %v39_v1  ;;  %211 = vmatprep.mubr.f32.mxu0 %v23_v4 }
   0x5   :  { %182 = vmatpush3.msra.mxu0 %v39_v1 }
   0x6   :  { %183 = vmatprep.subr.mxu0 %v38_v2 }
   0x7   :  { %184 = vmatpush3.msra.mxu0 %v38_v2 }
   0x8   :  { %8 = vsyncpa [#allocation4], 0  ;;  %185 = vmatprep.subr.mxu0 %v37_v3  ;;  %v35_v6 = vld [vmem:[%s327_s1 + $0x50] sm:$0xff]  ;;  %v34_v7 = vld [vmem:[%s327_s1 + $0x48] sm:$0xff] }
   0x9   :  { %186 = vmatpush3.msra.mxu0 %v37_v3  ;;  %v33_v8 = vld [vmem:[%s327_s1 + $0x40] sm:$0xff]  ;;  %v32_v9 = vld [vmem:[%s327_s1 + $0x38] sm:$0xff]  ;;  %v31_v10 = vld [vmem:[%s327_s1 + $0x30] sm:$0xff] }
   0xa   :  { %187 = vmatprep.subr.mxu0 %v36_v5  ;;  %v30_v11 = vld [vmem:[%s327_s1 + $0x28] sm:$0xff]  ;;  %v29_v12 = vld [vmem:[%s327_s1 + $0x20] sm:$0xff]  ;;  %v28_v13 = vld [vmem:[%s327_s1 + $0x18] sm:$0xff] }
   0xb   :  { %188 = vmatpush3.msra.mxu0 %v36_v5  ;;  %v27_v14 = vld [vmem:[%s327_s1 + $0x10] sm:$0xff]  ;;  %v26_v15 = vld [vmem:[%s327_s1 + $0x8] sm:$0xff]  ;;  %v25_v16 = vld [vmem:[%s327_s1] sm:$0xff]  ;;  %s243_s1 = smov [#allocation3]  }
   0xc   :  { %189 = vmatprep.subr.mxu0 %v35_v6  ;;  %v24_v17 = vld [vmem:[%s326_s0 + $0x8] sm:$0xff]  ;;  %v160_v18 = vld [vmem:[%s328_s2] ss:$0 sm:$0xff]  ;;  %s149_s0 = sshll.u32 %s243_s1, 4  ;;  %s150_s0 = int_to_ptr.vmem [resolvable:$true] %s149_s0 }
   0xd   :  { %190 = vmatpush3.msra.mxu0 %v35_v6  ;;  %s221_s2 = scalar_lea.vmem %s150_s0, 256  ;;  %p226_p1 = scmp.lt.s32.totalorder %s150_s0, %s150_s0 }
   0xe   :  { %191 = vmatprep.subr.mxu0 %v34_v7  ;;  %p222_p0 = scmp.ne.s32.totalorder %s150_s0, %s221_s2  ;;  %p227_p2 = scmp.lt.s32.totalorder %s221_s2, %s221_s2 }
   0xf   :  { %192 = vmatpush3.msra.mxu0 %v34_v7 }
  0x10   :  { %193 = vmatprep.subr.mxu0 %v33_v8  ;;  %p228_p3 = por %p227_p2, %p226_p1 }
  0x11   :  { %194 = vmatpush3.msra.mxu0 %v33_v8 }
  0x12   :  { %195 = vmatprep.subr.mxu0 %v32_v9  ;;  %p229_p4 = pnand %p228_p3, %p222_p0 }
  0x13   :  { %196 = vmatpush3.msra.mxu0 %v32_v9 }
  0x14   :  { %197 = vmatprep.subr.mxu0 %v31_v10 }
  0x15   :  { %198 = vmatpush3.msra.mxu0 %v31_v10 }
  0x16   :  { %199 = vmatprep.subr.mxu0 %v30_v11 }
  0x17   :  { %200 = vmatpush3.msra.mxu0 %v30_v11 }
  0x18   :  { %201 = vmatprep.subr.mxu0 %v29_v12 }
  0x19   :  { %202 = vmatpush3.msra.mxu0 %v29_v12 }
  0x1a   :  { %203 = vmatprep.subr.mxu0 %v28_v13 }
  0x1b   :  { %204 = vmatpush3.msra.mxu0 %v28_v13 }
  0x1c   :  { %205 = vmatprep.subr.mxu0 %v27_v14 }
  0x1d   :  { %206 = vmatpush3.msra.mxu0 %v27_v14 }
  0x1e   :  { %207 = vmatprep.subr.mxu0 %v26_v15 }
  0x1f   :  { %208 = vmatpush3.msra.mxu0 %v26_v15 }
  0x20   :  { %209 = vmatprep.subr.mxu0 %v25_v16 }
  0x21   :  { %210 = vmatpush3.msra.mxu0 %v25_v16 }
  0x22   :  { %212 = vmatmul.mubr.f32.vlgmr.msra.gmra.mxu0 %v24_v17 }
  0xe2   :  { %v213_v19 = vpop.f32.mrf.mxu0 }
  0xe3   :  { %v131_v20 = vadd.f32 %v213_v19, %v160_v18 }
  0xe4   :  { %v107_v21 = vpop.f32.mrf.mxu0 }
  0xe5   :  { %v135_v22 = vmul.f32 0.70710677, %v131_v20  ;;  %v130_v23 = vadd.f32 %v160_v18, %v107_v21  ;;  %v133_v26 = vmul.f32 0.5, %v131_v20 }
  0xe7   :  { %217 = verf.f32 %v135_v22  ;;  %v134_v24 = vmul.f32 0.70710677, %v130_v23  ;;  %v132_v30 = vmul.f32 0.5, %v130_v23 }
  0xe9   :  { %219 = verf.f32 %v134_v24 }
  0xf4   :  { %v218_v25 = vpop.eup %217 }
  0xf5   :  { %v139_v27 = vadd.f32 1.0, %v218_v25 }
  0xf6   :  { %v220_v28 = vpop.eup %219 }
  0xf7   :  { %v141_v29 = vmul.f32 %v139_v27, %v133_v26  ;;  %v138_v31 = vadd.f32 1.0, %v220_v28 }
  0xf9   :  { %143 = vst [vmem:[#allocation3 + $0x8] sm:$0xff] %v141_v29  ;;  %v140_v32 = vmul.f32 %v138_v31, %v132_v30 }
  0xfb   :  { %142 = vst [vmem:[#allocation3] sm:$0xff] %v140_v32 }
  0xfc   :  { %232 = shalt.err (!%p229_p4)
}
  0xfd   :  { %s244_s23 = smov 128   ;;  %s245_s24 = smov 8  }
  0xfe   :  { %155 = dma.vmem_to_hbm [thread:$0]  %s150_s0, 256, %s329_s3, [#allocation4], %s244_s23, %s244_s23, %s245_s24  }
  0xff   :  { %241 = dma.done.wait [#allocation4], 256  }
 0x100   :  { %242 = vsyncadd [#allocation4], 4294967040 }
 0x101   :  { %159 = vsyncpa [#allocation4], 1 }

</bundles_post_ra>
